<compile_context>
chip_gen: v6e
topology: v6e:2x2x1
jax: 0.10.0
libtpu: 0.0.40
codegen_flags: <defaults>
</compile_context>

<pallas_src>
import functools

import jax
import jax.numpy as jnp
import numpy as np
from jax.experimental import pallas as pl
from jax.experimental.pallas import tpu as pltpu


def _round_up(v, m):
    return -(-v // m) * m


# ----------------------------------------------------------------------------
# Pallas kernel: one (batch element, query tile) per grid step, all heads fused.
# ----------------------------------------------------------------------------
def gat_kernel(adj_ref, x_ref, w_ref, b_ref, perm_ref, out_ref,
               h_ref, st_ref, sn_ref, *,
               K, F_out, c_h, c_s, tq, N, negative_slope,
               out_mode, reuse_projection):
    """out_mode:
         "interleave" -> out block (1, F_out*K, tq)  (channel = f*K + k)
         "sum"        -> out block (1, F_out, tq)    (summed over heads)
         "per_head"   -> out block (1, K, F_out, tq) (fallback layout)
    """
    qi = pl.program_id(1)

    # ---- fused projection: all heads' fc + both attention halves, one matmul.
    # Rows [0, K*F_out) -> h, [c_h, c_h+K) -> s_t, [c_h+c_s, c_h+c_s+K) -> s_n.
    # Logit rows stay f32 (softmax inputs exact); h is cast once to the
    # aggregation compute dtype (bf16 path) when it is written to scratch.
    def project():
        proj = jax.lax.dot_general(
            w_ref[...], x_ref[0],
            dimension_numbers=(((1,), (0,)), ((), ())),
            preferred_element_type=jnp.float32,
        ) + b_ref[...]                                      # (c_tot, N) f32
        h_ref[...] = proj[:K * F_out].reshape(K, F_out, N).astype(h_ref.dtype)
        st_ref[...] = proj[c_h:c_h + K]
        sn_ref[...] = proj[c_h + c_s:c_h + c_s + K]

    if reuse_projection:
        @pl.when(qi == 0)
        def _():
            project()
    else:
        project()

    # ---- attention logits for this query tile (ref slices, no full loads) ----
    if tq == N:
        s_t = st_ref[...]                                   # (K, N)
        adj_rows = adj_ref[...]                             # (N, N) bf16
    else:
        start = pl.multiple_of(qi * tq, 128)                # tq % 128 == 0
        s_t = st_ref[:, pl.ds(start, tq)]                   # (K, tq)
        adj_rows = adj_ref[pl.ds(start, tq), :]             # (tq, N) bf16
    s_n = sn_ref[...]                                       # (K, N)

    e = s_t[:, :, None] + s_n[:, None, :]                   # (K, tq, N) f32
    if 0.0 <= negative_slope <= 1.0:
        e = jnp.maximum(e, negative_slope * e)              # leaky ReLU, 2 VALU ops
    else:
        e = jnp.where(e >= 0, e, negative_slope * e)
    e = e + adj_rows.astype(jnp.float32)[None, :, :]        # additive -1e30 mask

    # Softmax over the neighbor axis; masked entries underflow to exactly 0.
    m = jnp.max(e, axis=-1, keepdims=True)
    p = jnp.exp(e - m)
    denom = jnp.sum(p, axis=-1, keepdims=True)
    inv = pl.reciprocal(denom, approx=True)                 # EUP slot
    inv = inv * (2.0 - denom * inv)                         # Newton step -> f32 accuracy
    alpha = p * inv                                         # (K, tq, N)

    # ---- aggregation: out[k, f, i] = sum_j alpha[k, i, j] * h[k, f, j] ----
    h = h_ref[...]                                          # (K, F_out, N), compute dtype
    out = jax.lax.dot_general(
        h, alpha.astype(h.dtype),
        dimension_numbers=(((2,), (2,)), ((0,), (0,))),
        preferred_element_type=jnp.float32,
    )                                                       # (K, F_out, tq) f32

    if out_mode == "sum":
        out_ref[0] = jnp.sum(out, axis=0).astype(out_ref.dtype)
    elif out_mode == "interleave":
        # (f, k) -> f*K + k channel interleave done on the MXU with a resident
        # permutation matrix: one dense, lane-aligned HBM store, no XLU/sublane
        # transpose and no post-kernel XLA transpose pass.
        out2 = out.reshape(K * F_out, tq)                   # free merge (F_out % 8 == 0)
        out_ref[0] = jax.lax.dot_general(
            perm_ref[...], out2,
            dimension_numbers=(((1,), (0,)), ((), ())),
            preferred_element_type=jnp.float32,
        ).astype(out_ref.dtype)
    else:  # "per_head"
        out_ref[0] = out.astype(out_ref.dtype)


# ----------------------------------------------------------------------------
# Wrapper: reproduces GATLayer.forward semantics.
# ----------------------------------------------------------------------------
def gat_layer_forward(x_flat, adj, W, b, a, ab, *, negative_slope,
                      output_layer=False, q_tile=None,
                      compute_dtype=jnp.float32,
                      vmem_limit_bytes=None, reuse_projection=None):
    """Per-chip tuning: q_tile (multiple of 128) bounds the (K, tq, N) softmax
    intermediates; on v6e raise vmem_limit_bytes above the 32 MiB scoped
    default and use larger tiles (256-512); on v7x (64 MiB VMEM) use ~half the
    v6e tile and cap vmem_limit_bytes <= ~48 MiB; on v5e raise the 16 MiB
    default and keep tiles at 128."""
    B = x_flat.shape[0]
    K, F_out, F_in = W.shape
    N = adj.shape[0]

    # x.view(B, input_size, num_links): feature-major, N stays on the lane axis.
    x = jnp.asarray(x_flat, jnp.float32).reshape(B, F_in, N)

    # --- fuse all heads (+ attention vectors folded through fc) into one matrix
    W = jnp.asarray(W, jnp.float32)
    b2 = jnp.asarray(b, jnp.float32).reshape(K, F_out)
    a2 = jnp.asarray(a, jnp.float32).reshape(K, 2 * F_out)
    ab = jnp.asarray(ab, jnp.float32)
    a_t, a_n = a2[:, :F_out], a2[:, F_out:]

    c_h = _round_up(K * F_out, 8)      # 8-aligned sections -> aligned slices
    c_s = _round_up(K, 8)
    c_tot = c_h + 2 * c_s

    w_h = W.reshape(K * F_out, F_in)
    w_t = jnp.einsum("kf,kfi->ki", a_t, W)        # s_t weights (target half)
    w_n = jnp.einsum("kf,kfi->ki", a_n, W)        # s_n weights (neighbor half)
    b_h = b2.reshape(K * F_out)
    b_t = jnp.sum(a_t * b2, axis=-1) + ab         # attention bias folded into s_t
    b_n = jnp.sum(a_n * b2, axis=-1)

    def _pad0(v, rows):
        pad = [(0, rows - v.shape[0])] + [(0, 0)] * (v.ndim - 1)
        return jnp.pad(v, pad)

    w_fused = jnp.concatenate(
        [_pad0(w_h, c_h), _pad0(w_t, c_s), _pad0(w_n, c_s)], axis=0)
    b_fused = jnp.concatenate(
        [_pad0(b_h, c_h), _pad0(b_t, c_s), _pad0(b_n, c_s)]).reshape(c_tot, 1)

    # Additive adjacency bias in bf16 (exponent range covers -1e30); fetched
    # once thanks to a constant-index-map BlockSpec, upcast-added in-kernel.
    # Note: a node with no neighbors softmaxes uniformly instead of matching
    # the degenerate PyTorch loop there.
    adj_bias = jnp.where(jnp.asarray(adj) == 1, 0.0, -1e30).astype(jnp.bfloat16)

    # (f, k) -> f*K + k channel permutation matrix for the in-kernel interleave.
    C = K * F_out
    perm_np = np.zeros((C, C), np.float32)
    for k in range(K):
        for f in range(F_out):
            perm_np[f * K + k, k * F_out + f] = 1.0
    perm = jnp.asarray(perm_np)

    tq = N if q_tile is None else int(q_tile)
    if tq != N:
        assert N % tq == 0 and tq % 128 == 0, (
            "q_tile must divide num_links and be a multiple of 128 lanes")
    n_qt = N // tq

    # With B == 1 only the query-tile axis can feed v7x's second TensorCore:
    # recompute the (cheap) projection per tile so both axes are "parallel".
    if reuse_projection is None:
        reuse_projection = not (B == 1 and n_qt > 1)

    if output_layer:
        out_mode = "sum"
        out_shape = jax.ShapeDtypeStruct((B, F_out, N), jnp.float32)
        out_spec = pl.BlockSpec((1, F_out, tq), lambda bb, qi: (bb, 0, qi))
    elif F_out % 8 == 0:
        out_mode = "interleave"
        out_shape = jax.ShapeDtypeStruct((B, C, N), jnp.float32)
        out_spec = pl.BlockSpec((1, C, tq), lambda bb, qi: (bb, 0, qi))
    else:
        # TODO(synk): for F_out not a multiple of 8 the in-kernel channel
        # interleave would need an unaligned sublane merge; fall back to the
        # natural per-head layout plus one XLA transpose in the wrapper.
        out_mode = "per_head"
        out_shape = jax.ShapeDtypeStruct((B, K, F_out, N), jnp.float32)
        out_spec = pl.BlockSpec((1, K, F_out, tq), lambda bb, qi: (bb, 0, 0, qi))

    kernel = functools.partial(
        gat_kernel, K=K, F_out=F_out, c_h=c_h, c_s=c_s, tq=tq, N=N,
        negative_slope=float(negative_slope),
        out_mode=out_mode, reuse_projection=reuse_projection)

    flops = B * (2 * c_tot * F_in * N            # fused projection
                 + 6 * K * N * N                 # logits + softmax elementwise
                 + 2 * K * F_out * N * N)        # aggregation matmul
    cost = pl.CostEstimate(
        flops=int(flops),
        transcendentals=int(B * K * N * N),
        bytes_accessed=int(x.size * 4 + adj_bias.size * 2
                           + int(np.prod(out_shape.shape)) * 4))

    out = pl.pallas_call(
        kernel,
        out_shape=out_shape,
        grid=(B, n_qt),
        in_specs=[
            pl.BlockSpec((N, N), lambda bb, qi: (0, 0)),            # adj bias (resident, fetched once)
            pl.BlockSpec((1, F_in, N), lambda bb, qi: (bb, 0, 0)),  # x (lane = N)
            pl.BlockSpec((c_tot, F_in), lambda bb, qi: (0, 0)),     # fused W (resident)
            pl.BlockSpec((c_tot, 1), lambda bb, qi: (0, 0)),        # fused bias (resident)
            pl.BlockSpec((C, C), lambda bb, qi: (0, 0)),            # channel permutation (resident)
        ],
        out_specs=out_spec,
        scratch_shapes=[
            pltpu.VMEM((K, F_out, N), compute_dtype),   # projected features h
            pltpu.VMEM((K, N), jnp.float32),            # target logits   s_t (f32)
            pltpu.VMEM((K, N), jnp.float32),            # neighbor logits s_n (f32)
        ],
        compiler_params=pltpu.CompilerParams(
            dimension_semantics=(("parallel", "arbitrary") if reuse_projection
                                 else ("parallel", "parallel")),
            vmem_limit_bytes=vmem_limit_bytes),
        cost_estimate=cost,
    )(adj_bias, x, w_fused, b_fused, perm)

    if output_layer:
        # Head reduction already done in-kernel; only a small layout transpose
        # remains to match the module's (B, num_links, output_size) return.
        return jnp.transpose(out, (0, 2, 1))
    if out_mode == "interleave":
        return out                                   # already (B, F_out*K, N)
    return jnp.transpose(out, (0, 2, 1, 3)).reshape(B, F_out * K, N)


# ----------------------------------------------------------------------------
# Pure-numpy reference matching the PyTorch loop semantics exactly.
# ----------------------------------------------------------------------------
def gat_layer_reference(x_flat, adj, W, b, a, ab, *, negative_slope,
                        output_layer=False):
    x_flat = np.asarray(x_flat, np.float32)
    adj = np.asarray(adj)
    W, b, a, ab = (np.asarray(t, np.float32) for t in (W, b, a, ab))
    B = x_flat.shape[0]
    K, F_out, F_in = W.shape
    N = adj.shape[0]

    x = x_flat.reshape(B, F_in, N).transpose(0, 2, 1)       # (B, N, F_in)
    out = np.zeros((B, N, F_out, K), np.float32)
    for i in range(N):
        nbrs = np.where(adj[i, :] == 1)[0]
        for k in range(K):
            h_n = x[:, nbrs, :] @ W[k].T + b[k, 0]          # (B, n, F_out)
            h_t = x[:, i, :] @ W[k].T + b[k, 0]             # (B, F_out)
            h_t = np.repeat(h_t[:, None, :], len(nbrs), axis=1)
            cat = np.concatenate([h_t, h_n], axis=2)        # (B, n, 2*F_out)
            att = cat @ a[k, 0] + ab[k]                     # (B, n)
            att = np.where(att >= 0, att, negative_slope * att)
            att = att - att.max(axis=1, keepdims=True)
            att = np.exp(att)
            att = att / att.sum(axis=1, keepdims=True)
            out[:, i, :, k] = np.sum(att[:, :, None] * h_n, axis=1)
    if output_layer:
        return out.sum(axis=3)
    out = out.reshape(B, N, F_out * K)
    return out.transpose(0, 2, 1)


# ----------------------------------------------------------------------------
if __name__ == "__main__":
    def ring_adj(N):
        adj = np.zeros((N, N), np.float32)
        for i in range(N):
            adj[i, i] = 1.0
            adj[i, (i + 1) % N] = 1.0
            adj[i, (i - 1) % N] = 1.0
        return adj

    def make_params(key, K, F_out, F_in):
        k_w, k_b, k_a, k_ab = jax.random.split(key, 4)
        fc_bound = 1.0 / np.sqrt(F_in)
        at_bound = 1.0 / np.sqrt(2 * F_out)
        W = jax.random.uniform(k_w, (K, F_out, F_in), jnp.float32, -fc_bound, fc_bound)
        b = jax.random.uniform(k_b, (K, 1, F_out), jnp.float32, -fc_bound, fc_bound)
        a = jax.random.uniform(k_a, (K, 1, 2 * F_out), jnp.float32, -at_bound, at_bound)
        ab = jax.random.uniform(k_ab, (K,), jnp.float32, -at_bound, at_bound)
        return W, b, a, ab

    negative_slope = 0.2
    ok = True

    # ---- case 1: small shapes, single query tile --------------------------
    B, F_in, F_out, K, N = 2, 4, 8, 2, 8
    k_params, k_x = jax.random.split(jax.random.PRNGKey(0))
    W, b, a, ab = make_params(k_params, K, F_out, F_in)
    adj_np = ring_adj(N)
    x_flat = jax.random.normal(k_x, (B, F_in * N), jnp.float32)

    for output_layer in (False, True):
        out = jax.block_until_ready(
            gat_layer_forward(x_flat, jnp.asarray(adj_np), W, b, a, ab,
                              negative_slope=negative_slope,
                              output_layer=output_layer))
        ref = gat_layer_reference(np.asarray(x_flat), adj_np, np.asarray(W),
                                  np.asarray(b), np.asarray(a), np.asarray(ab),
                                  negative_slope=negative_slope,
                                  output_layer=output_layer)
        if not np.allclose(np.asarray(out), ref, rtol=1e-4, atol=1e-4):
            ok = False

    # bf16 aggregation path (attention logits stay f32): tolerance-checked.
    out_bf16 = jax.block_until_ready(
        gat_layer_forward(x_flat, jnp.asarray(adj_np), W, b, a, ab,
                          negative_slope=negative_slope, output_layer=False,
                          compute_dtype=jnp.bfloat16))
    ref = gat_layer_reference(np.asarray(x_flat), adj_np, np.asarray(W),
                              np.asarray(b), np.asarray(a), np.asarray(ab),
                              negative_slope=negative_slope, output_layer=False)
    if not np.allclose(np.asarray(out_bf16), ref, rtol=2e-2, atol=2e-2):
        ok = False

    # ---- case 2: 128-wide query tiles, B=1 (recompute-projection / megacore)
    B, F_in, F_out, K, N = 1, 4, 8, 2, 256
    k_params, k_x = jax.random.split(jax.random.PRNGKey(1))
    W, b, a, ab = make_params(k_params, K, F_out, F_in)
    adj_np = ring_adj(N)
    x_flat = jax.random.normal(k_x, (B, F_in * N), jnp.float32)
    out = jax.block_until_ready(
        gat_layer_forward(x_flat, jnp.asarray(adj_np), W, b, a, ab,
                          negative_slope=negative_slope, output_layer=False,
                          q_tile=128))
    ref = gat_layer_reference(np.asarray(x_flat), adj_np, np.asarray(W),
                              np.asarray(b), np.asarray(a), np.asarray(ab),
                              negative_slope=negative_slope, output_layer=False)
    if not np.allclose(np.asarray(out), ref, rtol=1e-4, atol=1e-4):
        ok = False

    print("KERNEL_OK" if ok else "KERNEL_MISMATCH")
</pallas_src>

<mosaic_0001>
module attributes {stable_mosaic.version = 11 : i64} {
  func.func @gat_kernel(%arg0: i32, %arg1: i32, %arg2: memref<8x8xbf16, #tpu.memory_space<vmem>>, %arg3: memref<1x4x8xf32, #tpu.memory_space<vmem>>, %arg4: memref<32x4xf32, #tpu.memory_space<vmem>>, %arg5: memref<32x1xf32, #tpu.memory_space<vmem>>, %arg6: memref<16x16xf32, #tpu.memory_space<vmem>>, %arg7: memref<1x16x8xf32, #tpu.memory_space<vmem>>, %arg8: memref<2x8x8xf32, #tpu.memory_space<vmem>>, %arg9: memref<2x8xf32, #tpu.memory_space<vmem>>, %arg10: memref<2x8xf32, #tpu.memory_space<vmem>>) attributes {dimension_semantics = [#tpu.dimension_semantics<parallel>, #tpu.dimension_semantics<arbitrary>], iteration_bounds = array<i64: 2, 1>, scalar_prefetch = 0 : i64, scratch_operands = 3 : i64, tpu.core_type = #tpu.core_type<tc>, window_params = [{pipeline_mode = #tpu.pipeline_mode<synchronous>, transform_indices = @transform_0, window_bounds = array<i64: 8, 8>}, {transform_indices = @transform_1, window_bounds = array<i64: 1, 4, 8>}, {pipeline_mode = #tpu.pipeline_mode<synchronous>, transform_indices = @transform_2, window_bounds = array<i64: 32, 4>}, {pipeline_mode = #tpu.pipeline_mode<synchronous>, transform_indices = @transform_3, window_bounds = array<i64: 32, 1>}, {pipeline_mode = #tpu.pipeline_mode<synchronous>, transform_indices = @transform_4, window_bounds = array<i64: 16, 16>}, {transform_indices = @transform_5, window_bounds = array<i64: 1, 16, 8>}]} {
    %c0_i32 = arith.constant 0 : i32
    %0 = arith.cmpi eq, %arg1, %c0_i32 : i32
    %1 = arith.extui %0 : i1 to i32
    %c0_i32_0 = arith.constant 0 : i32
    %2 = arith.cmpi ne, %1, %c0_i32_0 : i32
    scf.if %2 {
      %c0_19 = arith.constant 0 : index
      %c0_20 = arith.constant 0 : index
      %40 = vector.load %arg4[%c0_19, %c0_20] : memref<32x4xf32, #tpu.memory_space<vmem>>, vector<32x4xf32>
      %c0_21 = arith.constant 0 : index
      %c0_22 = arith.constant 0 : index
      %c0_23 = arith.constant 0 : index
      %41 = vector.load %arg3[%c0_21, %c0_22, %c0_23] : memref<1x4x8xf32, #tpu.memory_space<vmem>>, vector<1x4x8xf32>
      %42 = vector.shape_cast %41 : vector<1x4x8xf32> to vector<4x8xf32>
      %cst_24 = arith.constant dense<0.000000e+00> : vector<32x8xf32>
      %43 = tpu.matmul %40, %42, %cst_24 {dimension_numbers = #tpu.dot_dimension_numbers<[1], [0], [0], [1], [0, 0, 1, 1], [], []>} : vector<32x4xf32>, vector<4x8xf32>, vector<32x8xf32> -> vector<32x8xf32>
      %c0_25 = arith.constant 0 : index
      %c0_26 = arith.constant 0 : index
      %44 = vector.load %arg5[%c0_25, %c0_26] : memref<32x1xf32, #tpu.memory_space<vmem>>, vector<32x1xf32>
      %45 = vector.broadcast %44 : vector<32x1xf32> to vector<32x8xf32>
      %46 = arith.addf %43, %45 : vector<32x8xf32>
      %47 = vector.extract_strided_slice %46 {offsets = [0, 0], sizes = [16, 8], strides = [1, 1]} : vector<32x8xf32> to vector<16x8xf32>
      %48 = vector.shape_cast %47 : vector<16x8xf32> to vector<2x8x8xf32>
      %c0_27 = arith.constant 0 : index
      %c0_28 = arith.constant 0 : index
      %c0_29 = arith.constant 0 : index
      %49 = vector.load %arg8[%c0_27, %c0_28, %c0_29] : memref<2x8x8xf32, #tpu.memory_space<vmem>>, vector<2x8x8xf32>
      tpu.vector_store %arg8[%c0_27, %c0_28, %c0_29], %48 {strides = array<i32>} : memref<2x8x8xf32, #tpu.memory_space<vmem>>, vector<2x8x8xf32>,
      %50 = vector.extract_strided_slice %46 {offsets = [16, 0], sizes = [2, 8], strides = [1, 1]} : vector<32x8xf32> to vector<2x8xf32>
      %c0_30 = arith.constant 0 : index
      %c0_31 = arith.constant 0 : index
      %51 = vector.load %arg9[%c0_30, %c0_31] : memref<2x8xf32, #tpu.memory_space<vmem>>, vector<2x8xf32>
      tpu.vector_store %arg9[%c0_30, %c0_31], %50 {strides = array<i32>} : memref<2x8xf32, #tpu.memory_space<vmem>>, vector<2x8xf32>,
      %52 = vector.extract_strided_slice %46 {offsets = [24, 0], sizes = [2, 8], strides = [1, 1]} : vector<32x8xf32> to vector<2x8xf32>
      %c0_32 = arith.constant 0 : index
      %c0_33 = arith.constant 0 : index
      %53 = vector.load %arg10[%c0_32, %c0_33] : memref<2x8xf32, #tpu.memory_space<vmem>>, vector<2x8xf32>
      tpu.vector_store %arg10[%c0_32, %c0_33], %52 {strides = array<i32>} : memref<2x8xf32, #tpu.memory_space<vmem>>, vector<2x8xf32>,
    } else {
    }
    %c0 = arith.constant 0 : index
    %c0_1 = arith.constant 0 : index
    %3 = vector.load %arg9[%c0, %c0_1] : memref<2x8xf32, #tpu.memory_space<vmem>>, vector<2x8xf32>
    %c0_2 = arith.constant 0 : index
    %c0_3 = arith.constant 0 : index
    %4 = vector.load %arg2[%c0_2, %c0_3] : memref<8x8xbf16, #tpu.memory_space<vmem>>, vector<8x8xbf16>
    %c0_4 = arith.constant 0 : index
    %c0_5 = arith.constant 0 : index
    %5 = vector.load %arg10[%c0_4, %c0_5] : memref<2x8xf32, #tpu.memory_space<vmem>>, vector<2x8xf32>
    %6 = vector.shape_cast %3 : vector<2x8xf32> to vector<2x8x1xf32>
    %7 = vector.shape_cast %5 : vector<2x8xf32> to vector<2x1x8xf32>
    %8 = vector.broadcast %6 : vector<2x8x1xf32> to vector<2x8x8xf32>
    %9 = vector.broadcast %7 : vector<2x1x8xf32> to vector<2x8x8xf32>
    %10 = arith.addf %8, %9 : vector<2x8x8xf32>
    %cst = arith.constant 2.000000e-01 : f32
    %11 = vector.broadcast %cst : f32 to vector<2x8x8xf32>
    %12 = arith.mulf %11, %10 : vector<2x8x8xf32>
    %13 = arith.maximumf %10, %12 : vector<2x8x8xf32>
    %14 = arith.extf %4 : vector<8x8xbf16> to vector<8x8xf32>
    %15 = vector.shape_cast %14 : vector<8x8xf32> to vector<1x8x8xf32>
    %16 = vector.broadcast %15 : vector<1x8x8xf32> to vector<2x8x8xf32>
    %17 = arith.addf %13, %16 : vector<2x8x8xf32>
    %cst_6 = arith.constant dense<0xFF800000> : vector<2x8xf32>
    %18 = vector.multi_reduction <maximumf>, %17, %cst_6 [2] : vector<2x8x8xf32> to vector<2x8xf32>
    %19 = vector.shape_cast %18 : vector<2x8xf32> to vector<2x8x1xf32>
    %20 = vector.broadcast %19 : vector<2x8x1xf32> to vector<2x8x8xf32>
    %21 = arith.subf %17, %20 : vector<2x8x8xf32>
    %22 = math.exp %21 : vector<2x8x8xf32>
    %cst_7 = arith.constant dense<0.000000e+00> : vector<2x8xf32>
    %23 = vector.multi_reduction <add>, %22, %cst_7 [2] : vector<2x8x8xf32> to vector<2x8xf32>
    %24 = vector.shape_cast %23 : vector<2x8xf32> to vector<2x8x1xf32>
    %25 = tpu.reciprocal %24 {approx = true} : vector<2x8x1xf32> -> vector<2x8x1xf32>
    %26 = arith.mulf %24, %25 : vector<2x8x1xf32>
    %cst_8 = arith.constant 2.000000e+00 : f32
    %27 = vector.broadcast %cst_8 : f32 to vector<2x8x1xf32>
    %28 = arith.subf %27, %26 : vector<2x8x1xf32>
    %29 = arith.mulf %25, %28 : vector<2x8x1xf32>
    %30 = vector.broadcast %29 : vector<2x8x1xf32> to vector<2x8x8xf32>
    %31 = arith.mulf %22, %30 : vector<2x8x8xf32>
    %c0_9 = arith.constant 0 : index
    %c0_10 = arith.constant 0 : index
    %c0_11 = arith.constant 0 : index
    %32 = vector.load %arg8[%c0_9, %c0_10, %c0_11] : memref<2x8x8xf32, #tpu.memory_space<vmem>>, vector<2x8x8xf32>
    %cst_12 = arith.constant dense<0.000000e+00> : vector<2x8x8xf32>
    %33 = tpu.matmul %32, %31, %cst_12 {dimension_numbers = #tpu.dot_dimension_numbers<[2], [2], [1], [1], [0, 0, 0, 1, 1, 1], [0], [0]>} : vector<2x8x8xf32>, vector<2x8x8xf32>, vector<2x8x8xf32> -> vector<2x8x8xf32>
    %34 = vector.shape_cast %33 : vector<2x8x8xf32> to vector<16x8xf32>
    %c0_13 = arith.constant 0 : index
    %c0_14 = arith.constant 0 : index
    %35 = vector.load %arg6[%c0_13, %c0_14] : memref<16x16xf32, #tpu.memory_space<vmem>>, vector<16x16xf32>
    %cst_15 = arith.constant dense<0.000000e+00> : vector<16x8xf32>
    %36 = tpu.matmul %35, %34, %cst_15 {dimension_numbers = #tpu.dot_dimension_numbers<[1], [0], [0], [1], [0, 0, 1, 1], [], []>} : vector<16x16xf32>, vector<16x8xf32>, vector<16x8xf32> -> vector<16x8xf32>
    %c0_16 = arith.constant 0 : index
    %c0_17 = arith.constant 0 : index
    %c0_18 = arith.constant 0 : index
    %37 = vector.load %arg7[%c0_16, %c0_17, %c0_18] : memref<1x16x8xf32, #tpu.memory_space<vmem>>, vector<1x16x8xf32>
    %38 = vector.shape_cast %37 : vector<1x16x8xf32> to vector<16x8xf32>
    %39 = vector.shape_cast %36 : vector<16x8xf32> to vector<1x16x8xf32>
    tpu.vector_store %arg7[%c0_16, %c0_17, %c0_18], %39 {strides = array<i32>} : memref<1x16x8xf32, #tpu.memory_space<vmem>>, vector<1x16x8xf32>,
    return
  }
  func.func @transform_0(%arg0: i32, %arg1: i32) -> (i32, i32) {
    %c0_i32 = arith.constant 0 : i32
    %c0_i32_0 = arith.constant 0 : i32
    %c0_i32_1 = arith.constant 0 : i32
    return %c0_i32, %c0_i32_0 : i32, i32
  }
  func.func @transform_1(%arg0: i32, %arg1: i32) -> (i32, i32, i32) {
    %c0_i32 = arith.constant 0 : i32
    %c0_i32_0 = arith.constant 0 : i32
    %c0_i32_1 = arith.constant 0 : i32
    return %arg0, %c0_i32, %c0_i32_0 : i32, i32, i32
  }
  func.func @transform_2(%arg0: i32, %arg1: i32) -> (i32, i32) {
    %c0_i32 = arith.constant 0 : i32
    %c0_i32_0 = arith.constant 0 : i32
    %c0_i32_1 = arith.constant 0 : i32
    return %c0_i32, %c0_i32_0 : i32, i32
  }
  func.func @transform_3(%arg0: i32, %arg1: i32) -> (i32, i32) {
    %c0_i32 = arith.constant 0 : i32
    %c0_i32_0 = arith.constant 0 : i32
    %c0_i32_1 = arith.constant 0 : i32
    return %c0_i32, %c0_i32_0 : i32, i32
  }
  func.func @transform_4(%arg0: i32, %arg1: i32) -> (i32, i32) {
    %c0_i32 = arith.constant 0 : i32
    %c0_i32_0 = arith.constant 0 : i32
    %c0_i32_1 = arith.constant 0 : i32
    return %c0_i32, %c0_i32_0 : i32, i32
  }
  func.func @transform_5(%arg0: i32, %arg1: i32) -> (i32, i32, i32) {
    %c0_i32 = arith.constant 0 : i32
    %c0_i32_0 = arith.constant 0 : i32
    return %arg0, %c0_i32, %arg1 : i32, i32, i32
  }
}

</mosaic_0001>

<bundles_post_ra>
// kernel: tpu_custom_call.1
= control target key start
LH: loop header
LB: loop body
LE: loop exit
PB: predicated region body
PF: predicated region fallthrough
CT: control target
= control target key end

     0   :  { %s945_s18 = smov 0   ;;  %s947_s19 = smov 0   ;;  %s1036_s0 = inlined_call_operand.vmem [shape: bf16[8,8], index: 0, kind: input, shape index: {}]   ;;  %s1037_s1 = inlined_call_operand.vmem [shape: f32[2,4,8], index: 1, kind: input, shape index: {}]   ;;  %s1038_s2 = inlined_call_operand.vmem [shape: f32[32,4], index: 2, kind: input, shape index: {}]   ;;  %s1039_s3 = inlined_call_operand.vmem [shape: f32[32,1], index: 3, kind: input, shape index: {}]   ;;  %s1040_s4 = inlined_call_operand.vmem [shape: f32[16,16], index: 4, kind: input, shape index: {}]   ;;  %s1041_s5 = inlined_call_operand.vmem [shape: f32[2,16,8], index: 5, kind: output, shape index: {}]  }
   0x1   :  { %s949_s20 = smov 0  }
   0x2 LB: > { %s27_s21 = sadd.s32 1, %s905_s19  ;;  %p792_p0 = scmp.ge.s32.totalorder %s909_s20, 1  ;;  %s909_s20 = sphi %s949_s20, %s15_s20   ;;  %s905_s19 = sphi %s947_s19, %s1043_s19   ;;  %s901_s18 = sphi %s945_s18, %s1042_s18  }
   0x3   : > { %p29_p1 = scmp.ge.s32.totalorder %s27_s21, 2  ;;  %p200_p2 = scmp.lt.s32.totalorder %s909_s20, 3 }
   0x5   : > { %s1045_s21 = smov (%p29_p1, %s27_s21), 0  ;;  %p201_p3 = pnand %p792_p0, %p200_p2 }
   0x6   : > { %p230_p4 = scmp.lt.s32.totalorder (!%p201_p3), %s901_s18, 1 }
   0x7   : > { %204 = sbr.rel (%p201_p3) target bundleno = 1070 (0x42e), region = 40 }
   0xc   : > { %v246_v0 = vld [vmem:[%s1038_s2] sm:$0xff]  ;;  %vm275_vm0 = vcmask 31744   ;;  %v253_v1 = vld [vmem:[%s1039_s3 + $0x10] sm:$0xff]  ;;  %s1047_s18 = smov (!%p230_p4, %s901_s18), 1  ;;  %v911_v2 = vmov 0   ;;  %vm288_vm1 = vcmask 1043456   ;;  %v386_v12 = vlaneseq }
   0xd   : > { %826 = vmatprep.mubr.msk.f32.mxu0 %vm275_vm0, %v246_v0  ;;  %877 = vset.pattern.permute.xlu0 %v911_v2  ;;  %s793_s26 = sshll.u32 %s1047_s18, 2  ;;  %v254_v3 = vld [vmem:[%s1039_s3 + $0x18] sm:$0xff]  ;;  %v247_v5 = vld [vmem:[%s1038_s2 + $0x8] sm:$0xff]  ;;  %v248_v6 = vld [vmem:[%s1038_s2 + $0x10] sm:$0xff]  ;;  %v912_v13 = vmov 1966171168  }
   0xe   : > { %878 = vset.pattern.permute.xlu1 %v911_v2  ;;  %267 = vperm.xlu0 %877, %v253_v1   ;;  %s233_s6 = scalar_lea.vmem %s1037_s1, %s793_s26  ;;  %v249_v7 = vld [vmem:[%s1038_s2 + $0x18] sm:$0xff]  ;;  %v410_v14 = vunpack.c.l.s4 %v912_v13  ;;  %vm380_vm2 = vcmask 58368   ;;  %v387_v19 = vshrl.u32 %v386_v12, 7  ;;  %v384_v34 = vld [vmem:[%s1036_s0] sm:$0xf]  ;;  %vm377_vm3 = vcmask 64512  }
   0xf   : > { %v250_v4 = vld [vmem:[%s233_s6] sm:$0xf]  ;;  %v439_v37 = vunpack.c.l.bf16 %v384_v34  ;;  %v252_v60 = vld [vmem:[%s1039_s3 + $0x8] sm:$0xff]  ;;  %v913_v61 = vmov 0.0   ;;  %vm914_vm4 = vmmov 0   ;;  %vm627_vm5 = vcmask 130048  }
  0x10   : > { %824 = vmatprep.subr.msk.mxu0 %vm288_vm1, %v250_v4  ;;  %v411_v20 = vunpack.c.0.s8 %v410_v14  ;;  %v388_v22 = vsub.s32 0, %v387_v19  ;;  %v395_v28 = vsub.s32 1, %v387_v19  ;;  %v251_v47 = vld [vmem:[%s1039_s3] sm:$0xff]  ;;  %832 = vmatprep.subr.mxu1 %v913_v61  ;;  %s810_s27 = sshll.u32 %s1047_s18, 4 }
  0x11   : > { %825 = vmatpush3.msk.msra.mxu0 %vm288_vm1, %v250_v4  ;;  %834 = vmatprep.mubr.msk.f32.mxu1 %vm914_vm4, %v913_v61  ;;  %v625_v14 = vld [vmem:[%s1040_s4] sm:$0xff]  ;;  %s241_s30 = scalar_lea.vmem %s1041_s5, %s810_s27 }
  0x12   : > { %272 = vperm.xlu0 %877, %v254_v3   ;;  %827 = vmatmul.mubr.msk.f32.vlgmr.msra.gmra.mxu0 %vm275_vm0, %v247_v5  ;;  %v414_v21 = vsub.s32 %v411_v20, %v387_v19  ;;  %v626_v19 = vld [vmem:[%s1040_s4 + $0x8] sm:$0xff] }
  0x13   : > { %829 = vmatprep.mubr.msk.f32.mxu0 %vm275_vm0, %v248_v6 }
  0x16   : > { %830 = vmatmul.mubr.msk.f32.gmra.mxu0 %vm275_vm0, %v249_v7 }
  0x17   : > { %846 = vmatprep.mubr.msk.f32.mxu0 %vm627_vm5, %v625_v14 }
  0x89   : > { %v268_v8 = vpop.permute.xlu0 %267 }
  0x8d   : > { %v273_v11 = vpop.permute.xlu0 %272 }
  0xd2   : > { %v991_v9 = vpop.f32.mrf.mxu0 }
  0xd4   : > { %v358_v10 = vpop.f32.mrf.mxu0 }
  0xd6   : > { %v831_v15 = vpop.f32.mrf.mxu0 }
  0xd7   : > { %v374_v16 = vadd.f32 %v831_v15, %v273_v11 }
  0xd8   : > { %v368_v17 = vpop.f32.mrf.mxu0 }
  0xd9   : > { %382 = vst.msk [vmem:[#allocation4] sm:$0x3] %vm380_vm2, %v374_v16  ;;  %v369_v18 = vadd.f32 %v368_v17, %v268_v8 }
  0xdb   : > { %381 = vst.msk [vmem:[#allocation3] sm:$0x3] %vm380_vm2, %v369_v18 }
  0xe0   : > { %v801_v23 = vld.sshfl [vmem:[#allocation4] sm:$0x11 pattern:$0x75316420] }
  0xe1   : > { %v415_v24 = vrot.slane %v801_v23, %v414_v21  ;;  %v408_v25 = vcombine.high %v801_v23, %v801_v23 }
  0xe2   : > { %v383_v26 = vld [vmem:[#allocation3] sm:$0x3] }
  0xe3   : > { %v389_v27 = vrot.slane %v383_v26, %v388_v22  ;;  %v426_v29 = vrot.slane %v415_v24, %v388_v22  ;;  %v422_v30 = vrot.slane %v408_v25, %v414_v21  ;;  %v396_v32 = vrot.slane %v383_v26, %v395_v28 }
  0xe5   : > { %391 = vbcast.lane.b32.xlu1 %v389_v27, 256  ;;  %v430_v31 = vrot.slane %v422_v30, %v388_v22 }
  0xe9   : > { %398 = vbcast.lane.b32.xlu1 %v396_v32, 256 }
 0x157   : > { %v392_v33 = vpop.permute.xlu1 %391 }
 0x158   : > { %v433_v35 = vadd.f32 %v426_v29, %v392_v33 }
 0x15a   : > { %v435_v36 = vmul.f32 0.2, %v433_v35 }
 0x15b   : > { %v399_v38 = vpop.permute.xlu1 %398 }
 0x15c   : > { %v437_v39 = vmax.f32 %v433_v35, %v435_v36  ;;  %v434_v40 = vadd.f32 %v430_v31, %v399_v38 }
 0x15e   : > { %v436_v41 = vmul.f32 0.2, %v434_v40  ;;  %v440_v42 = vadd.f32 %v439_v37, %v437_v39 }
 0x160   : > { %v438_v43 = vmax.f32 %v434_v40, %v436_v41  ;;  %v443_v44 = vsel %vm377_vm3, %v440_v42, -inf }
 0x161   : > { %444 = vmax.xlane.f32.xlu0 %v443_v44 }
 0x162   : > { %v441_v45 = vadd.f32 %v439_v37, %v438_v43 }
 0x164   : > { %v446_v46 = vsel %vm377_vm3, %v441_v45, -inf }
 0x165   : > { %447 = vmax.xlane.f32.xlu1 %v446_v46 }
 0x176   : > { %257 = vperm.xlu1 %878, %v251_v47  }
 0x1ea   : > { %v445_v48 = vpop.xlane.xlu0 %444 }
 0x1eb   : > { %v449_v49 = vsub.f32 %v440_v42, %v445_v48 }
 0x1ed   : > { %v451_v50 = vmul.f32 1.442695, %v449_v49 }
 0x1ee   : > { %v448_v51 = vpop.xlane.xlu1 %447 }
 0x1ef   : > { %879 = vpow2.f32 %v451_v50  ;;  %v450_v52 = vsub.f32 %v441_v45, %v448_v51 }
 0x1f1   : > { %v453_v53 = vmul.f32 1.442695, %v450_v52 }
 0x1f2   : > { %v258_v54 = vpop.permute.xlu1 %257 }
 0x1f3   : > { %881 = vpow2.f32 %v453_v53  ;;  %v359_v55 = vadd.f32 %v358_v10, %v258_v54 }
 0x1f5   : > { %378 = vst.msk [vmem:[#allocation2] sm:$0xff] %vm377_vm3, %v359_v55 }
 0x1fc   : > { %v880_v56 = vpop.eup %879  ;;  %v471_v13 = vld [vmem:[#allocation2] sm:$0xff] }
 0x1fd   : > { %v455_v57 = vsel %vm377_vm3, %v880_v56, 0.0 }
 0x1fe   : > { %456 = vadd.xlane.f32.xlu0 %v455_v57 }
 0x200   : > { %v882_v58 = vpop.eup %881 }
 0x201   : > { %v458_v59 = vsel %vm377_vm3, %v882_v58, 0.0 }
 0x202   : > { %459 = vadd.xlane.f32.xlu0 %v458_v59 }
 0x218   : > { %262 = vperm.xlu0 %877, %v252_v60  }
 0x287   : > { %v457_v62 = vpop.xlane.xlu0 %456 }
 0x288   : > { %883 = vrcp.f32 %v457_v62 }
 0x28b   : > { %v460_v63 = vpop.xlane.xlu0 %459 }
 0x28c   : > { %885 = vrcp.f32 %v460_v63 }
 0x293   : > { %v263_v0 = vpop.permute.xlu0 %262 }
 0x294   : > { %v364_v1 = vadd.f32 %v991_v9, %v263_v0 }
 0x295   : > { %v884_v2 = vpop.eup %883 }
 0x296   : > { %v463_v3 = vmul.f32 %v884_v2, %v457_v62  ;;  %379 = vst.msk [vmem:[#allocation2 + $0x8] sm:$0xff] %vm377_vm3, %v364_v1 }
 0x298   : > { %v465_v4 = vsub.f32 2.0, %v463_v3 }
 0x299   : > { %v886_v5 = vpop.eup %885 }
 0x29a   : > { %v467_v6 = vmul.f32 %v884_v2, %v465_v4  ;;  %v464_v7 = vmul.f32 %v886_v5, %v460_v63 }
 0x29c   : > { %v466_v8 = vsub.f32 2.0, %v464_v7  ;;  %v469_v10 = vmul.f32 %v880_v56, %v467_v6 }
 0x29d   : > { %v472_v9 = vld [vmem:[#allocation2 + $0x8] sm:$0xff] }
 0x29e   : > { %v468_v11 = vmul.f32 %v886_v5, %v466_v8  ;;  %833 = vmatpush3.xpose.msk.msra.mxu1 %vm377_vm3, %v469_v10 }
 0x29f   : > { %837 = vmatprep.subr.mxu1 %v913_v61 }
 0x2a0   : > { %v470_v12 = vmul.f32 %v882_v58, %v468_v11 }
 0x2a1   : > { %835 = vmatmul.mubr.msk.f32.vlgmr.msra.gmra.mxu1 %vm377_vm3, %v471_v13 }
 0x2a2   : > { %838 = vmatpush3.xpose.msk.msra.mxu1 %vm377_vm3, %v470_v12  ;;  %839 = vmatprep.mubr.msk.f32.mxu1 %vm914_vm4, %v913_v61 }
 0x2a5   : > { %840 = vmatmul.mubr.msk.f32.vlgmr.msra.gmra.mxu1 %vm377_vm3, %v472_v9 }
 0x361   : > { %v545_v15 = vpop.f32.mrf.mxu1 }
 0x363   : > { %v836_v16 = vpop.f32.mrf.mxu1 }
 0x365   : > { %v621_v17 = vpop.f32.mrf.mxu1 }
 0x366   : > { %842 = vmatprep.subr.mxu0 %v621_v17 }
 0x367   : > { %v841_v18 = vpop.f32.mrf.mxu1  ;;  %843 = vmatpush3.msra.mxu0 %v621_v17 }
 0x368   : > { %844 = vmatprep.subr.mxu0 %v545_v15 }
 0x369   : > { %845 = vmatpush3.msra.mxu0 %v545_v15 }
 0x36a   : > { %847 = vmatmul.mubr.msk.f32.vlgmr.msra.gmra.mxu0 %vm627_vm5, %v626_v19 }
 0x42a   : > { %v848_v20 = vpop.f32.mrf.mxu0 }
 0x42b   : > { %710 = vst.msk [vmem:[%s241_s30 + $0x8] sm:$0xff] %vm377_vm3, %v848_v20 }
 0x42c   : > { %v700_v21 = vpop.f32.mrf.mxu0 }
 0x42d   : > { %709 = vst.msk [vmem:[%s241_s30] sm:$0xff] %vm377_vm3, %v700_v21 }
 0x42e PF: > { %s15_s20 = sadd.s32 1, %s909_s20   ;;  %s1042_s18 = smov %s905_s19 }
 0x42f   : > { %p12_p5 = scmp.ge.s32.totalorder %s15_s20, 4   ;;  %s1043_s19 = smov %s1045_s21 }
 0x431   :  { %14 = sbr.rel (!%p12_p5) target bundleno = 2 (0x2), region = 74 }

</bundles_post_ra>
